<compile_context>
chip_gen: v7x
topology: tpu7x:2x2x1
jax: 0.10.0
libtpu: 0.0.40
codegen_flags: <defaults>
</compile_context>

<pallas_src>
import functools

import jax
import jax.numpy as jnp
from jax import lax
from jax.experimental import pallas as pl
from jax.experimental.pallas import tpu as pltpu


def _aff_kernel(e1_ref, e2_ref, e3_ref,
                w1a_ref, w1b_ref, w1c_ref, b1_ref,
                w2r_ref, b2_ref, hh_ref, ww_ref,
                o_ref, *, H, W):
    # e*_ref : (1, C_i, H*W)      one encoder feature map, spatial on lanes
    # w1*_ref: (Cmid_p, C_i)      1x1-conv weight slice for that encoder input
    # b1_ref : (Cmid_p, 1)
    # w2r_ref: (Cout, 9*Cmid_p)   3x3-conv weight, tap-major im2col layout
    # b2_ref : (Cout, 1)
    # hh_ref : (1, H*W) int32     row index of each flattened spatial position
    # ww_ref : (1, H*W) int32     col index of each flattened spatial position
    # o_ref  : (1, Cout, H*W)
    HW = H * W

    # ---- stage 1: 1x1 conv (channel-mixing matmul) + bias + ReLU -----------
    # The PyTorch channel concat is folded into three partial matmuls.
    y = jnp.dot(w1a_ref[...], e1_ref[0], preferred_element_type=jnp.float32)
    y = y + jnp.dot(w1b_ref[...], e2_ref[0], preferred_element_type=jnp.float32)
    y = y + jnp.dot(w1c_ref[...], e3_ref[0], preferred_element_type=jnp.float32)
    y = jnp.maximum(y + b1_ref[...], 0.0)                # (Cmid_p, HW) f32

    # ---- stage 2: 3x3 'same' conv via lane-rolled taps + one matmul --------
    hh = hh_ref[...]                                     # (1, HW)
    ww = ww_ref[...]                                     # (1, HW)
    taps = []
    for dh in (-1, 0, 1):
        for dw in (-1, 0, 1):
            # shifted[:, p] = y[:, p + dh*W + dw]   (masked to zero padding)
            shift = (-(dh * W + dw)) % HW                # static, non-negative
            t = pltpu.roll(y, shift, axis=1) if shift else y
            cond = None
            if dh == 1:
                cond = hh < (H - 1)
            elif dh == -1:
                cond = hh >= 1
            if dw == 1:
                c = ww < (W - 1)
                cond = c if cond is None else (cond & c)
            elif dw == -1:
                c = ww >= 1
                cond = c if cond is None else (cond & c)
            if cond is not None:
                t = jnp.where(cond, t, 0.0)              # 'same' zero padding
            taps.append(t)
    # Each tap is (Cmid_p, HW) with Cmid_p a multiple of 8 -> aligned stack.
    patches = jnp.concatenate(taps, axis=0)              # (9*Cmid_p, HW)

    out = jnp.dot(w2r_ref[...], patches,
                  preferred_element_type=jnp.float32) + b2_ref[...]
    o_ref[0] = out.astype(o_ref.dtype)


def aff_pallas(e1, e2, e3, w1a, w1b, w1c, b1r, w2r, b2r, hh, ww, *, H, W):
    N, C1, HW = e1.shape
    C2, C3 = e2.shape[1], e3.shape[1]
    Cmid_p = w1a.shape[0]
    Cout = w2r.shape[0]

    kernel = functools.partial(_aff_kernel, H=H, W=W)
    img_map = lambda n: (n, 0, 0)
    cst_map = lambda n: (0, 0)

    return pl.pallas_call(
        kernel,
        out_shape=jax.ShapeDtypeStruct((N, Cout, HW), e1.dtype),
        grid_spec=pltpu.PrefetchScalarGridSpec(
            num_scalar_prefetch=0,
            grid=(N,),
            in_specs=[
                pl.BlockSpec((1, C1, HW), img_map),
                pl.BlockSpec((1, C2, HW), img_map),
                pl.BlockSpec((1, C3, HW), img_map),
                pl.BlockSpec((Cmid_p, C1), cst_map),
                pl.BlockSpec((Cmid_p, C2), cst_map),
                pl.BlockSpec((Cmid_p, C3), cst_map),
                pl.BlockSpec((Cmid_p, 1), cst_map),
                pl.BlockSpec((Cout, 9 * Cmid_p), cst_map),
                pl.BlockSpec((Cout, 1), cst_map),
                pl.BlockSpec((1, HW), cst_map),
                pl.BlockSpec((1, HW), cst_map),
            ],
            out_specs=pl.BlockSpec((1, Cout, HW), img_map),
        ),
        compiler_params=pltpu.CompilerParams(
            dimension_semantics=("parallel",),
            vmem_limit_bytes=32 * 1024 * 1024),
    )(e1, e2, e3, w1a, w1b, w1c, b1r, w2r, b2r, hh, ww)


def aff_forward(eb1, eb2, eb3, w1, b1, w2, b2):
    """PyTorch-convention params: eb* NCHW; w1 (Cmid,Cin,1,1); b1 (Cmid,);
    w2 (Cout,Cmid,3,3); b2 (Cout,). Returns NCHW output."""
    N, C1, H, W = eb1.shape
    C2, C3 = eb2.shape[1], eb3.shape[1]
    Cmid, Cin = w1.shape[0], w1.shape[1]
    Cout = w2.shape[0]
    HW = H * W
    Cmid_p = ((Cmid + 7) // 8) * 8     # pad stage-1 channels to a sublane tile

    # Activations: flatten spatial onto the lane axis (contiguous => free).
    e1 = eb1.reshape(N, C1, HW)
    e2 = eb2.reshape(N, C2, HW)
    e3 = eb3.reshape(N, C3, HW)

    # Weight / bias relayouts (tiny, one-time, outside the hot loop).
    w1t = jnp.pad(w1.reshape(Cmid, Cin), ((0, Cmid_p - Cmid), (0, 0)))
    w1a = w1t[:, 0:C1]
    w1b = w1t[:, C1:C1 + C2]
    w1c = w1t[:, C1 + C2:C1 + C2 + C3]
    b1r = jnp.pad(b1, (0, Cmid_p - Cmid)).reshape(Cmid_p, 1)
    w2p = jnp.pad(w2, ((0, 0), (0, Cmid_p - Cmid), (0, 0), (0, 0)))
    w2r = jnp.transpose(w2p, (0, 2, 3, 1)).reshape(Cout, 9 * Cmid_p)
    b2r = b2.reshape(Cout, 1)

    # Flattened-index row / col coordinates for the 3x3 boundary masks.
    sp = jnp.arange(HW, dtype=jnp.int32)
    hh = (sp // W).reshape(1, HW)
    ww = (sp % W).reshape(1, HW)

    out = aff_pallas(e1, e2, e3, w1a, w1b, w1c, b1r, w2r, b2r, hh, ww, H=H, W=W)
    return out.reshape(N, Cout, H, W)


def _reference(eb1, eb2, eb3, w1, b1, w2, b2):
    """Pure-JAX reference (mirrors the PyTorch module)."""
    x = jnp.concatenate([eb1, eb2, eb3], axis=1)          # NCHW
    y = lax.conv_general_dilated(x, w1, (1, 1), "VALID",
                                 dimension_numbers=("NCHW", "OIHW", "NCHW"))
    y = jnp.maximum(y + b1.reshape(1, -1, 1, 1), 0.0)
    out = lax.conv_general_dilated(y, w2, (1, 1), ((1, 1), (1, 1)),
                                   dimension_numbers=("NCHW", "OIHW", "NCHW"))
    return out + b2.reshape(1, -1, 1, 1)


if __name__ == "__main__":
    # 3 encoder outputs, each (N=2, C=4, H=16, W=16) -> Cin=12, Cout=Cmid=4.
    N, C_each, H, W = 2, 4, 16, 16
    Cin = 3 * C_each
    Cout = 4
    Cmid = Cout   # first BasicBlock maps in_channels -> out_channels

    key = jax.random.PRNGKey(0)
    k1, k2, k3, kw1, kb1, kw2, kb2 = jax.random.split(key, 7)

    eb1 = jax.random.normal(k1, (N, C_each, H, W), jnp.float32)
    eb2 = jax.random.normal(k2, (N, C_each, H, W), jnp.float32)
    eb3 = jax.random.normal(k3, (N, C_each, H, W), jnp.float32)

    # Parameters in PyTorch layouts (OIHW conv weights, 1-D biases).
    w1 = jax.random.normal(kw1, (Cmid, Cin, 1, 1), jnp.float32) * 0.1
    b1 = jax.random.normal(kb1, (Cmid,), jnp.float32) * 0.01
    w2 = jax.random.normal(kw2, (Cout, Cmid, 3, 3), jnp.float32) * 0.1
    b2 = jax.random.normal(kb2, (Cout,), jnp.float32) * 0.01

    out = aff_forward(eb1, eb2, eb3, w1, b1, w2, b2)
    out = jax.block_until_ready(out)

    ref = _reference(eb1, eb2, eb3, w1, b1, w2, b2)
    assert out.shape == (N, Cout, H, W), out.shape
    assert jnp.allclose(out, ref, atol=1e-4, rtol=1e-4), (
        float(jnp.max(jnp.abs(out - ref))))
    print("KERNEL_OK")
</pallas_src>

<mosaic_0001>
module attributes {stable_mosaic.version = 11 : i64} {
  func.func @_aff_kernel(%arg0: i32, %arg1: memref<1x4x256xf32, #tpu.memory_space<vmem>>, %arg2: memref<1x4x256xf32, #tpu.memory_space<vmem>>, %arg3: memref<1x4x256xf32, #tpu.memory_space<vmem>>, %arg4: memref<8x4xf32, #tpu.memory_space<vmem>>, %arg5: memref<8x4xf32, #tpu.memory_space<vmem>>, %arg6: memref<8x4xf32, #tpu.memory_space<vmem>>, %arg7: memref<8x1xf32, #tpu.memory_space<vmem>>, %arg8: memref<4x72xf32, #tpu.memory_space<vmem>>, %arg9: memref<4x1xf32, #tpu.memory_space<vmem>>, %arg10: memref<1x256xi32, #tpu.memory_space<vmem>>, %arg11: memref<1x256xi32, #tpu.memory_space<vmem>>, %arg12: memref<1x4x256xf32, #tpu.memory_space<vmem>>) attributes {dimension_semantics = [#tpu.dimension_semantics<parallel>], iteration_bounds = array<i64: 2>, scalar_prefetch = 0 : i64, scratch_operands = 0 : i64, tpu.core_type = #tpu.core_type<tc>, window_params = [{transform_indices = @transform_0, window_bounds = array<i64: 1, 4, 256>}, {transform_indices = @transform_1, window_bounds = array<i64: 1, 4, 256>}, {transform_indices = @transform_2, window_bounds = array<i64: 1, 4, 256>}, {pipeline_mode = #tpu.pipeline_mode<synchronous>, transform_indices = @transform_3, window_bounds = array<i64: 8, 4>}, {pipeline_mode = #tpu.pipeline_mode<synchronous>, transform_indices = @transform_4, window_bounds = array<i64: 8, 4>}, {pipeline_mode = #tpu.pipeline_mode<synchronous>, transform_indices = @transform_5, window_bounds = array<i64: 8, 4>}, {pipeline_mode = #tpu.pipeline_mode<synchronous>, transform_indices = @transform_6, window_bounds = array<i64: 8, 1>}, {pipeline_mode = #tpu.pipeline_mode<synchronous>, transform_indices = @transform_7, window_bounds = array<i64: 4, 72>}, {pipeline_mode = #tpu.pipeline_mode<synchronous>, transform_indices = @transform_8, window_bounds = array<i64: 4, 1>}, {pipeline_mode = #tpu.pipeline_mode<synchronous>, transform_indices = @transform_9, window_bounds = array<i64: 1, 256>}, {pipeline_mode = #tpu.pipeline_mode<synchronous>, transform_indices = @transform_10, window_bounds = array<i64: 1, 256>}, {transform_indices = @transform_11, window_bounds = array<i64: 1, 4, 256>}]} {
    %c0 = arith.constant 0 : index
    %c0_0 = arith.constant 0 : index
    %0 = vector.load %arg4[%c0, %c0_0] : memref<8x4xf32, #tpu.memory_space<vmem>>, vector<8x4xf32>
    %c0_1 = arith.constant 0 : index
    %c0_2 = arith.constant 0 : index
    %c0_3 = arith.constant 0 : index
    %1 = vector.load %arg1[%c0_1, %c0_2, %c0_3] : memref<1x4x256xf32, #tpu.memory_space<vmem>>, vector<1x4x256xf32>
    %2 = vector.shape_cast %1 : vector<1x4x256xf32> to vector<4x256xf32>
    %cst = arith.constant dense<0.000000e+00> : vector<8x256xf32>
    %3 = tpu.matmul %0, %2, %cst {dimension_numbers = #tpu.dot_dimension_numbers<[1], [0], [0], [1], [0, 0, 1, 1], [], []>} : vector<8x4xf32>, vector<4x256xf32>, vector<8x256xf32> -> vector<8x256xf32>
    %c0_4 = arith.constant 0 : index
    %c0_5 = arith.constant 0 : index
    %4 = vector.load %arg5[%c0_4, %c0_5] : memref<8x4xf32, #tpu.memory_space<vmem>>, vector<8x4xf32>
    %c0_6 = arith.constant 0 : index
    %c0_7 = arith.constant 0 : index
    %c0_8 = arith.constant 0 : index
    %5 = vector.load %arg2[%c0_6, %c0_7, %c0_8] : memref<1x4x256xf32, #tpu.memory_space<vmem>>, vector<1x4x256xf32>
    %6 = vector.shape_cast %5 : vector<1x4x256xf32> to vector<4x256xf32>
    %cst_9 = arith.constant dense<0.000000e+00> : vector<8x256xf32>
    %7 = tpu.matmul %4, %6, %cst_9 {dimension_numbers = #tpu.dot_dimension_numbers<[1], [0], [0], [1], [0, 0, 1, 1], [], []>} : vector<8x4xf32>, vector<4x256xf32>, vector<8x256xf32> -> vector<8x256xf32>
    %8 = arith.addf %3, %7 : vector<8x256xf32>
    %c0_10 = arith.constant 0 : index
    %c0_11 = arith.constant 0 : index
    %9 = vector.load %arg6[%c0_10, %c0_11] : memref<8x4xf32, #tpu.memory_space<vmem>>, vector<8x4xf32>
    %c0_12 = arith.constant 0 : index
    %c0_13 = arith.constant 0 : index
    %c0_14 = arith.constant 0 : index
    %10 = vector.load %arg3[%c0_12, %c0_13, %c0_14] : memref<1x4x256xf32, #tpu.memory_space<vmem>>, vector<1x4x256xf32>
    %11 = vector.shape_cast %10 : vector<1x4x256xf32> to vector<4x256xf32>
    %cst_15 = arith.constant dense<0.000000e+00> : vector<8x256xf32>
    %12 = tpu.matmul %9, %11, %cst_15 {dimension_numbers = #tpu.dot_dimension_numbers<[1], [0], [0], [1], [0, 0, 1, 1], [], []>} : vector<8x4xf32>, vector<4x256xf32>, vector<8x256xf32> -> vector<8x256xf32>
    %13 = arith.addf %8, %12 : vector<8x256xf32>
    %c0_16 = arith.constant 0 : index
    %c0_17 = arith.constant 0 : index
    %14 = vector.load %arg7[%c0_16, %c0_17] : memref<8x1xf32, #tpu.memory_space<vmem>>, vector<8x1xf32>
    %15 = vector.broadcast %14 : vector<8x1xf32> to vector<8x256xf32>
    %16 = arith.addf %13, %15 : vector<8x256xf32>
    %cst_18 = arith.constant 0.000000e+00 : f32
    %17 = vector.broadcast %cst_18 : f32 to vector<8x256xf32>
    %18 = arith.maximumf %16, %17 : vector<8x256xf32>
    %c0_19 = arith.constant 0 : index
    %c0_20 = arith.constant 0 : index
    %19 = vector.load %arg10[%c0_19, %c0_20] : memref<1x256xi32, #tpu.memory_space<vmem>>, vector<1x256xi32>
    %c0_21 = arith.constant 0 : index
    %c0_22 = arith.constant 0 : index
    %20 = vector.load %arg11[%c0_21, %c0_22] : memref<1x256xi32, #tpu.memory_space<vmem>>, vector<1x256xi32>
    %c17_i32 = arith.constant 17 : i32
    %21 = tpu.dynamic_rotate %18 by %c17_i32 dim 1 : vector<8x256xf32>, i32 -> vector<8x256xf32>
    %c1_i32 = arith.constant 1 : i32
    %22 = vector.broadcast %c1_i32 : i32 to vector<1x256xi32>
    %23 = arith.cmpi sge, %19, %22 : vector<1x256xi32>
    %c1_i32_23 = arith.constant 1 : i32
    %24 = vector.broadcast %c1_i32_23 : i32 to vector<1x256xi32>
    %25 = arith.cmpi sge, %20, %24 : vector<1x256xi32>
    %26 = arith.andi %23, %25 : vector<1x256xi1>
    %cst_24 = arith.constant 0.000000e+00 : f32
    %27 = vector.shape_cast %26 : vector<1x256xi1> to vector<1x256xi1>
    %28 = vector.broadcast %27 : vector<1x256xi1> to vector<8x256xi1>
    %29 = vector.broadcast %cst_24 : f32 to vector<8x256xf32>
    %30 = arith.select %28, %21, %29 : vector<8x256xi1>, vector<8x256xf32>
    %c16_i32 = arith.constant 16 : i32
    %31 = tpu.dynamic_rotate %18 by %c16_i32 dim 1 : vector<8x256xf32>, i32 -> vector<8x256xf32>
    %c1_i32_25 = arith.constant 1 : i32
    %32 = vector.broadcast %c1_i32_25 : i32 to vector<1x256xi32>
    %33 = arith.cmpi sge, %19, %32 : vector<1x256xi32>
    %cst_26 = arith.constant 0.000000e+00 : f32
    %34 = vector.shape_cast %33 : vector<1x256xi1> to vector<1x256xi1>
    %35 = vector.broadcast %34 : vector<1x256xi1> to vector<8x256xi1>
    %36 = vector.broadcast %cst_26 : f32 to vector<8x256xf32>
    %37 = arith.select %35, %31, %36 : vector<8x256xi1>, vector<8x256xf32>
    %c15_i32 = arith.constant 15 : i32
    %38 = tpu.dynamic_rotate %18 by %c15_i32 dim 1 : vector<8x256xf32>, i32 -> vector<8x256xf32>
    %c1_i32_27 = arith.constant 1 : i32
    %39 = vector.broadcast %c1_i32_27 : i32 to vector<1x256xi32>
    %40 = arith.cmpi sge, %19, %39 : vector<1x256xi32>
    %c15_i32_28 = arith.constant 15 : i32
    %41 = vector.broadcast %c15_i32_28 : i32 to vector<1x256xi32>
    %42 = arith.cmpi slt, %20, %41 : vector<1x256xi32>
    %43 = arith.andi %40, %42 : vector<1x256xi1>
    %cst_29 = arith.constant 0.000000e+00 : f32
    %44 = vector.shape_cast %43 : vector<1x256xi1> to vector<1x256xi1>
    %45 = vector.broadcast %44 : vector<1x256xi1> to vector<8x256xi1>
    %46 = vector.broadcast %cst_29 : f32 to vector<8x256xf32>
    %47 = arith.select %45, %38, %46 : vector<8x256xi1>, vector<8x256xf32>
    %c1_i32_30 = arith.constant 1 : i32
    %48 = tpu.dynamic_rotate %18 by %c1_i32_30 dim 1 : vector<8x256xf32>, i32 -> vector<8x256xf32>
    %c1_i32_31 = arith.constant 1 : i32
    %49 = vector.broadcast %c1_i32_31 : i32 to vector<1x256xi32>
    %50 = arith.cmpi sge, %20, %49 : vector<1x256xi32>
    %cst_32 = arith.constant 0.000000e+00 : f32
    %51 = vector.shape_cast %50 : vector<1x256xi1> to vector<1x256xi1>
    %52 = vector.broadcast %51 : vector<1x256xi1> to vector<8x256xi1>
    %53 = vector.broadcast %cst_32 : f32 to vector<8x256xf32>
    %54 = arith.select %52, %48, %53 : vector<8x256xi1>, vector<8x256xf32>
    %c255_i32 = arith.constant 255 : i32
    %55 = tpu.dynamic_rotate %18 by %c255_i32 dim 1 : vector<8x256xf32>, i32 -> vector<8x256xf32>
    %c15_i32_33 = arith.constant 15 : i32
    %56 = vector.broadcast %c15_i32_33 : i32 to vector<1x256xi32>
    %57 = arith.cmpi slt, %20, %56 : vector<1x256xi32>
    %cst_34 = arith.constant 0.000000e+00 : f32
    %58 = vector.shape_cast %57 : vector<1x256xi1> to vector<1x256xi1>
    %59 = vector.broadcast %58 : vector<1x256xi1> to vector<8x256xi1>
    %60 = vector.broadcast %cst_34 : f32 to vector<8x256xf32>
    %61 = arith.select %59, %55, %60 : vector<8x256xi1>, vector<8x256xf32>
    %c241_i32 = arith.constant 241 : i32
    %62 = tpu.dynamic_rotate %18 by %c241_i32 dim 1 : vector<8x256xf32>, i32 -> vector<8x256xf32>
    %c15_i32_35 = arith.constant 15 : i32
    %63 = vector.broadcast %c15_i32_35 : i32 to vector<1x256xi32>
    %64 = arith.cmpi slt, %19, %63 : vector<1x256xi32>
    %c1_i32_36 = arith.constant 1 : i32
    %65 = vector.broadcast %c1_i32_36 : i32 to vector<1x256xi32>
    %66 = arith.cmpi sge, %20, %65 : vector<1x256xi32>
    %67 = arith.andi %64, %66 : vector<1x256xi1>
    %cst_37 = arith.constant 0.000000e+00 : f32
    %68 = vector.shape_cast %67 : vector<1x256xi1> to vector<1x256xi1>
    %69 = vector.broadcast %68 : vector<1x256xi1> to vector<8x256xi1>
    %70 = vector.broadcast %cst_37 : f32 to vector<8x256xf32>
    %71 = arith.select %69, %62, %70 : vector<8x256xi1>, vector<8x256xf32>
    %c240_i32 = arith.constant 240 : i32
    %72 = tpu.dynamic_rotate %18 by %c240_i32 dim 1 : vector<8x256xf32>, i32 -> vector<8x256xf32>
    %c15_i32_38 = arith.constant 15 : i32
    %73 = vector.broadcast %c15_i32_38 : i32 to vector<1x256xi32>
    %74 = arith.cmpi slt, %19, %73 : vector<1x256xi32>
    %cst_39 = arith.constant 0.000000e+00 : f32
    %75 = vector.shape_cast %74 : vector<1x256xi1> to vector<1x256xi1>
    %76 = vector.broadcast %75 : vector<1x256xi1> to vector<8x256xi1>
    %77 = vector.broadcast %cst_39 : f32 to vector<8x256xf32>
    %78 = arith.select %76, %72, %77 : vector<8x256xi1>, vector<8x256xf32>
    %c239_i32 = arith.constant 239 : i32
    %79 = tpu.dynamic_rotate %18 by %c239_i32 dim 1 : vector<8x256xf32>, i32 -> vector<8x256xf32>
    %c15_i32_40 = arith.constant 15 : i32
    %80 = vector.broadcast %c15_i32_40 : i32 to vector<1x256xi32>
    %81 = arith.cmpi slt, %19, %80 : vector<1x256xi32>
    %c15_i32_41 = arith.constant 15 : i32
    %82 = vector.broadcast %c15_i32_41 : i32 to vector<1x256xi32>
    %83 = arith.cmpi slt, %20, %82 : vector<1x256xi32>
    %84 = arith.andi %81, %83 : vector<1x256xi1>
    %cst_42 = arith.constant 0.000000e+00 : f32
    %85 = vector.shape_cast %84 : vector<1x256xi1> to vector<1x256xi1>
    %86 = vector.broadcast %85 : vector<1x256xi1> to vector<8x256xi1>
    %87 = vector.broadcast %cst_42 : f32 to vector<8x256xf32>
    %88 = arith.select %86, %79, %87 : vector<8x256xi1>, vector<8x256xf32>
    %89 = tpu.concatenate %30, %37, %47, %54, %18, %61, %71, %78, %88 in 0 : vector<8x256xf32>, vector<8x256xf32>, vector<8x256xf32>, vector<8x256xf32>, vector<8x256xf32>, vector<8x256xf32>, vector<8x256xf32>, vector<8x256xf32>, vector<8x256xf32> -> vector<72x256xf32>
    %c0_43 = arith.constant 0 : index
    %c0_44 = arith.constant 0 : index
    %90 = vector.load %arg8[%c0_43, %c0_44] : memref<4x72xf32, #tpu.memory_space<vmem>>, vector<4x72xf32>
    %cst_45 = arith.constant dense<0.000000e+00> : vector<4x256xf32>
    %91 = tpu.matmul %90, %89, %cst_45 {dimension_numbers = #tpu.dot_dimension_numbers<[1], [0], [0], [1], [0, 0, 1, 1], [], []>} : vector<4x72xf32>, vector<72x256xf32>, vector<4x256xf32> -> vector<4x256xf32>
    %c0_46 = arith.constant 0 : index
    %c0_47 = arith.constant 0 : index
    %92 = vector.load %arg9[%c0_46, %c0_47] : memref<4x1xf32, #tpu.memory_space<vmem>>, vector<4x1xf32>
    %93 = vector.broadcast %92 : vector<4x1xf32> to vector<4x256xf32>
    %94 = arith.addf %91, %93 : vector<4x256xf32>
    %c0_48 = arith.constant 0 : index
    %c0_49 = arith.constant 0 : index
    %c0_50 = arith.constant 0 : index
    %95 = vector.load %arg12[%c0_48, %c0_49, %c0_50] : memref<1x4x256xf32, #tpu.memory_space<vmem>>, vector<1x4x256xf32>
    %96 = vector.shape_cast %95 : vector<1x4x256xf32> to vector<4x256xf32>
    %97 = vector.shape_cast %94 : vector<4x256xf32> to vector<1x4x256xf32>
    tpu.vector_store %arg12[%c0_48, %c0_49, %c0_50], %97 {strides = array<i32>} : memref<1x4x256xf32, #tpu.memory_space<vmem>>, vector<1x4x256xf32>,
    return
  }
  func.func @transform_0(%arg0: i32) -> (i32, i32, i32) {
    %c0_i32 = arith.constant 0 : i32
    %c0_i32_0 = arith.constant 0 : i32
    %c0_i32_1 = arith.constant 0 : i32
    return %arg0, %c0_i32, %c0_i32_0 : i32, i32, i32
  }
  func.func @transform_1(%arg0: i32) -> (i32, i32, i32) {
    %c0_i32 = arith.constant 0 : i32
    %c0_i32_0 = arith.constant 0 : i32
    %c0_i32_1 = arith.constant 0 : i32
    return %arg0, %c0_i32, %c0_i32_0 : i32, i32, i32
  }
  func.func @transform_2(%arg0: i32) -> (i32, i32, i32) {
    %c0_i32 = arith.constant 0 : i32
    %c0_i32_0 = arith.constant 0 : i32
    %c0_i32_1 = arith.constant 0 : i32
    return %arg0, %c0_i32, %c0_i32_0 : i32, i32, i32
  }
  func.func @transform_3(%arg0: i32) -> (i32, i32) {
    %c0_i32 = arith.constant 0 : i32
    %c0_i32_0 = arith.constant 0 : i32
    %c0_i32_1 = arith.constant 0 : i32
    return %c0_i32, %c0_i32_0 : i32, i32
  }
  func.func @transform_4(%arg0: i32) -> (i32, i32) {
    %c0_i32 = arith.constant 0 : i32
    %c0_i32_0 = arith.constant 0 : i32
    %c0_i32_1 = arith.constant 0 : i32
    return %c0_i32, %c0_i32_0 : i32, i32
  }
  func.func @transform_5(%arg0: i32) -> (i32, i32) {
    %c0_i32 = arith.constant 0 : i32
    %c0_i32_0 = arith.constant 0 : i32
    %c0_i32_1 = arith.constant 0 : i32
    return %c0_i32, %c0_i32_0 : i32, i32
  }
  func.func @transform_6(%arg0: i32) -> (i32, i32) {
    %c0_i32 = arith.constant 0 : i32
    %c0_i32_0 = arith.constant 0 : i32
    %c0_i32_1 = arith.constant 0 : i32
    return %c0_i32, %c0_i32_0 : i32, i32
  }
  func.func @transform_7(%arg0: i32) -> (i32, i32) {
    %c0_i32 = arith.constant 0 : i32
    %c0_i32_0 = arith.constant 0 : i32
    %c0_i32_1 = arith.constant 0 : i32
    return %c0_i32, %c0_i32_0 : i32, i32
  }
  func.func @transform_8(%arg0: i32) -> (i32, i32) {
    %c0_i32 = arith.constant 0 : i32
    %c0_i32_0 = arith.constant 0 : i32
    %c0_i32_1 = arith.constant 0 : i32
    return %c0_i32, %c0_i32_0 : i32, i32
  }
  func.func @transform_9(%arg0: i32) -> (i32, i32) {
    %c0_i32 = arith.constant 0 : i32
    %c0_i32_0 = arith.constant 0 : i32
    %c0_i32_1 = arith.constant 0 : i32
    return %c0_i32, %c0_i32_0 : i32, i32
  }
  func.func @transform_10(%arg0: i32) -> (i32, i32) {
    %c0_i32 = arith.constant 0 : i32
    %c0_i32_0 = arith.constant 0 : i32
    %c0_i32_1 = arith.constant 0 : i32
    return %c0_i32, %c0_i32_0 : i32, i32
  }
  func.func @transform_11(%arg0: i32) -> (i32, i32, i32) {
    %c0_i32 = arith.constant 0 : i32
    %c0_i32_0 = arith.constant 0 : i32
    %c0_i32_1 = arith.constant 0 : i32
    return %arg0, %c0_i32, %c0_i32_0 : i32, i32, i32
  }
}

</mosaic_0001>

<bundles_post_ra>
// kernel: tpu_custom_call.1
= control target key start
LH: loop header
LB: loop body
LE: loop exit
PB: predicated region body
PF: predicated region fallthrough
CT: control target
= control target key end

     0   :  { %16 = vsyncpa [#allocation3], 0  ;;  %s1685_s0 = inlined_call_operand.vmem [shape: f32[2,4,256], index: 0, kind: input, shape index: {}]   ;;  %s1686_s1 = inlined_call_operand.vmem [shape: f32[2,4,256], index: 1, kind: input, shape index: {}]   ;;  %s1687_s2 = inlined_call_operand.vmem [shape: f32[2,4,256], index: 2, kind: input, shape index: {}]   ;;  %s1688_s3 = inlined_call_operand.vmem [shape: f32[8,4], index: 3, kind: input, shape index: {}]   ;;  %s1689_s4 = inlined_call_operand.vmem [shape: f32[8,4], index: 4, kind: input, shape index: {}]   ;;  %s1690_s5 = inlined_call_operand.vmem [shape: f32[8,4], index: 5, kind: input, shape index: {}]   ;;  %s1691_s6 = inlined_call_operand.vmem [shape: f32[8,1], index: 6, kind: input, shape index: {}]   ;;  %s1692_s7 = inlined_call_operand.vmem [shape: f32[4,72], index: 7, kind: input, shape index: {}]   ;;  %s1693_s8 = inlined_call_operand.vmem [shape: f32[4,1], index: 8, kind: input, shape index: {}]   ;;  %s1694_s9 = inlined_call_operand.vmem [shape: s32[1,256], index: 9, kind: input, shape index: {}]   ;;  %s1695_s10 = inlined_call_operand.vmem [shape: s32[1,256], index: 10, kind: input, shape index: {}]   ;;  %s1696_s11 = inlined_call_operand.hbm [shape: f32[2,4,256], index: 11, kind: output, shape index: {}]  }
   0x1   :  { %18 = vsyncpa [#allocation3 + $0x1], 0  ;;  %s1341_s17 = smov 0   ;;  %s1343_s18 = smov 0  }
   0x2   :  { %s1345_s19 = smov 0   ;;  %s1347_s20 = smov 0  }
   0x3 LB: > { %1698 = sst [smem:[#allocation5_spill]] %s1263_s19  ;;  %s1362_s21 = sadd.s32 4294967295, %s1267_s20   ;;  %s1267_s20 = sphi %s1347_s20, %s1736_s20   ;;  %s1263_s19 = sphi %s1345_s19, %s1733_s19   ;;  %s1259_s18 = sphi %s1343_s18, %s1735_s18   ;;  %s1255_s17 = sphi %s1341_s17, %s1734_s17  }
   0x4   : > { %s1042_s22 = sadd.s32 4294967294, %s1267_s20   ;;  %s1366_s23 = sadd.s32 1, %s1267_s20  }
   0x5   : > { %s277_s24 = sadd.s32 1, %s1263_s19  ;;  %s274_s25 = ssub.s32 %s1267_s20, %s1366_s23 }
   0x6   : > { %p287_p0 = scmp.ne.s32.totalorder %s1263_s19, %s1259_s18  ;;  %p275_p1 = scmp.eq.s32.totalorder %s274_s25, 0 }
   0x7   : > { %p288_p2 = scmp.eq.s32.totalorder %s1362_s21, 1  ;;  %p293_p3 = scmp.ne.s32.totalorder %s1259_s18, %s1255_s17 }
   0x8   : > { %p294_p4 = scmp.eq.s32.totalorder %s1042_s22, 1  ;;  %p1045_p7 = scmp.ge.s32.totalorder %s1267_s20, 1 }
   0x9   : > { %s1377_s26 = scalar_select %p275_p1, %s1263_s19, %s277_s24  }
   0xa   : > { %p1379_p5 = por %p288_p2, %p287_p0  ;;  %p1383_p6 = por %p294_p4, %p293_p3 }
   0xb   : > { %1699 = sst [smem:[#allocation6_spill]] %s1377_s26  ;;  %p360_p8 = scmp.lt.s32.totalorder %s1267_s20, 3 }
   0xd   : > { %p361_p9 = pnand %p1045_p7, %p360_p8 }
   0xe   : > { %p410_p10 = scmp.lt.s32.totalorder (!%p361_p9), %s1362_s21, 1  ;;  %v1269_v0 = vmov (!%p361_p9), 0.0   ;;  %v675_v1 = vld [vmem:[%s1691_s6] sm:$0xff] (!%p361_p9)  ;;  %v1270_v2 = vmov (!%p361_p9), 0   ;;  %vm435_vm0 = vcmask (!%p361_p9), 1043456   ;;  %vm431_vm1 = vcmask (!%p361_p9), 31744  }
   0xf   : > { %364 = sbr.rel (%p361_p9) target bundleno = 636 (0x27c), region = 64  ;;  %504 = vmatprep.mubr.f32.mxu0 (!%p361_p9), %v1269_v0  ;;  %932 = vmatprep.mubr.f32.mxu1 (!%p361_p9), %v1269_v0  ;;  %v427_v8 = vld [vmem:[%s1689_s4] sm:$0xff] (!%p361_p9)  ;;  %s1271_s15 = smov (!%p361_p9), 16   ;;  %v691_v21 = vlaneseq (!%p361_p9) }
  0x10   : > { %1166 = vset.pattern.permute.xlu0 (!%p361_p9), %v1270_v2  ;;  %v425_v10 = vld [vmem:[%s1688_s3] sm:$0xff] (!%p361_p9)  ;;  %s1273_s22 = smov (!%p361_p9), 15   ;;  %s1274_s24 = smov (!%p361_p9), 1  }
  0x11   : > { %678 = vperm.xlu0 (!%p361_p9), %1166, %v675_v1   ;;  %v591_v11 = vld [vmem:[%s1690_s5] sm:$0xff] (!%p361_p9)  ;;  %s1277_s30 = smov (!%p361_p9), 112   ;;  %v701_v24 = vshrl.u32 (!%p361_p9), %v691_v21, 7  ;;  %v1457_v31 = vand.u32 (!%p361_p9), 127, %v691_v21 }
  0x12   : > { %v858_v20 = vld [vmem:[%s1693_s8] sm:$0xf] (!%p361_p9) }
  0x13   : > { %v1433_v22 = vld [vmem:[%s1694_s9] sm:$0x3] (!%p361_p9)  ;;  %v1447_v25 = vsub.s32 (!%p361_p9), 1, %v701_v24  ;;  %v1449_v26 = vsub.s32 (!%p361_p9), 0, %v701_v24  ;;  %vm736_vm8 = vcmp.lt.s32.totalorder (!%p361_p9), %v1457_v31, 15  ;;  %vm693_vm9 = vcmp.lt.s32.totalorder (!%p361_p9), %v1457_v31, 17 }
  0x14   : > { %v1438_v23 = vld [vmem:[%s1695_s10] sm:$0x3] (!%p361_p9)  ;;  %vm696_vm2 = vcmp.ge.s32.totalorder (!%p361_p9), %v1433_v22, 1  ;;  %vm801_vm7 = vcmp.lt.s32.totalorder (!%p361_p9), %v1433_v22, 15  ;;  %vm716_vm10 = vcmp.lt.s32.totalorder (!%p361_p9), %v1457_v31, 16  ;;  %vm758_vm15 = vcmp.lt.s32.totalorder (!%p361_p9), %v1457_v31, 1 }
  0x15   : > { %vm697_vm3 = vcmp.ge.s32.totalorder (!%p361_p9), %v1438_v23, 1  ;;  %vm739_vm4 = vcmp.lt.s32.totalorder (!%p361_p9), %v1438_v23, 15  ;;  %v719_v28 = vsel (!%p361_p9), %vm696_vm2, 1, %v1270_v2 }
  0x16   : > { %s411_s12 = scalar_select %p410_p10, %s1362_s21, 1  ;;  %vm698_vm5 = vmand %vm696_vm2, %vm697_vm3  ;;  %v761_v30 = vsel %vm697_vm3, 1, %v1270_v2  ;;  %v727_v33 = vrot.slane %v719_v28, %v1447_v25  ;;  %v723_v35 = vrot.slane %v719_v28, %v1449_v26  ;;  %v781_v43 = vsel %vm739_vm4, 1, %v1270_v2 }
  0x17   : > { %vm740_vm6 = vmand %vm696_vm2, %vm739_vm4  ;;  %v699_v27 = vsel %vm698_vm5, 1, %v1270_v2  ;;  %v769_v37 = vrot.slane %v761_v30, %v1447_v25  ;;  %v765_v39 = vrot.slane %v761_v30, %v1449_v26  ;;  %v789_v55 = vrot.slane %v781_v43, %v1447_v25 }
  0x18   : > { %s1084_s13 = sshll.u32 %s411_s12, 3  ;;  %s1278_s12 = smov 111   ;;  %v741_v29 = vsel %vm740_vm6, 1, %v1270_v2  ;;  %v707_v32 = vrot.slane %v699_v27, %v1447_v25  ;;  %v703_v34 = vrot.slane %v699_v27, %v1449_v26  ;;  %vm1475_vm12 = vcmp.eq.s32.totalorder %v727_v33, 1  ;;  %vm802_vm14 = vmand %vm801_vm7, %vm697_vm3 }
  0x19   : > { %s414_s16 = scalar_lea.vmem %s1685_s0, %s1084_s13  ;;  %s419_s25 = scalar_lea.vmem %s1686_s1, %s1084_s13  ;;  %v749_v36 = vrot.slane %v741_v29, %v1447_v25  ;;  %v745_v38 = vrot.slane %v741_v29, %v1449_v26  ;;  %vm1499_vm2 = vcmp.eq.s32.totalorder %v769_v37, 1  ;;  %vm1507_vm5 = vcmp.eq.s32.totalorder %v765_v39, 1 }
  0x1a   : > { %s424_s29 = scalar_lea.vmem %s1687_s2, %s1084_s13  ;;  %v426_v3 = vld [vmem:[%s414_s16] sm:$0xff]  ;;  %s1272_s16 = smov 17   ;;  %vm1471_vm11 = vcmp.eq.s32.totalorder %v707_v32, 1  ;;  %vm1479_vm13 = vcmp.eq.s32.totalorder %v703_v34, 1  ;;  %v803_v56 = vsel %vm802_vm14, 1, %v1270_v2  ;;  %v785_v1 = vrot.slane %v781_v43, %v1449_v26 }
  0x1b   : > { %v428_v4 = vld [vmem:[%s419_s25] sm:$0xff]  ;;  %v512_v7 = vcombine.high %v426_v3, %v426_v3  ;;  %s1275_s25 = smov 127   ;;  %vm1503_vm3 = vcmp.eq.s32.totalorder %v745_v38, 1  ;;  %vm1089_vm6 = vmpackc.low %vm1475_vm12, %vm1471_vm11  ;;  %vm1538_vm11 = vcmp.eq.s32.totalorder %v789_v55, 1  ;;  %v807_v24 = vrot.slane %v803_v56, %v1449_v26 }
  0x1c   : > { %v430_v5 = vcombine.high %v428_v4, %v428_v4  ;;  %v592_v6 = vld [vmem:[%s424_s29] sm:$0xff]  ;;  %s1276_s29 = smov 113   ;;  %vm1560_vm12 = vmand %vm801_vm7, %vm739_vm4  ;;  %vm798_vm4 = vcmp.lt.s32.totalorder %v1457_v31, 113 }
  0x1d   : > { %v594_v9 = vcombine.high %v592_v6, %v592_v6  ;;  %v844_v30 = vsel %vm1560_vm12, 1, %v1270_v2 }
  0x1e   : > { %1053 = vmatprep.subr.msk.mxu0 %vm435_vm0, %v430_v5  ;;  %v848_v48 = vrot.slane %v844_v30, %v1449_v26 }
  0x1f   : > { %1054 = vmatpush1.msk.msra.mxu0 %vm435_vm0, %v428_v4 }
  0x20   : > { %1055 = vmatmul.mubr.msk.f32.vlgmr.msra.gmra.mrb[0].mxu0 %vm431_vm1, %v427_v8  ;;  %1056 = vmatprep.subr.msk.mxu0 %vm435_vm0, %v512_v7  ;;  %vm853_vm12 = vcmp.eq.s32.totalorder %v848_v48, 1 }
  0x21   : > { %1057 = vmatpush1.msk.msra.mxu0 %vm435_vm0, %v426_v3  ;;  %584 = vmatprep.mubr.f32.mxu0 %v1269_v0  ;;  %v823_v3 = vsel %vm801_vm7, 1, %v1270_v2  ;;  %vm820_vm7 = vcmp.lt.s32.totalorder %v1457_v31, 112 }
  0x22   : > { %1059 = vmatprep.subr.msk.mxu0 %vm435_vm0, %v594_v9  ;;  %v811_v9 = vrot.slane %v803_v56, %v1447_v25  ;;  %v831_v21 = vrot.slane %v823_v3, %v1447_v25  ;;  %v827_v28 = vrot.slane %v823_v3, %v1449_v26 }
  0x28   : > { %1058 = vmatmul.mubr.msk.f32.vlgmr.msra.gmra.mrb[0].mxu0 %vm431_vm1, %v425_v10 }
  0x29   : > { %1060 = vmatpush1.msk.msra.mxu0 %vm435_vm0, %v592_v6  ;;  %666 = vmatprep.mubr.f32.mxu0 %v1269_v0  ;;  %vm1491_vm0 = vcmp.eq.s32.totalorder %v723_v35, 1 }
  0x2a   : > { %vm1092_vm14 = vmpackc.low %vm1491_vm0, %vm1479_vm13  ;;  %vm1570_vm13 = vcmp.eq.s32.totalorder %v785_v1, 1  ;;  %vm1279_vm0 = vmmov 1  }
  0x30   : > { %1061 = vmatmul.mubr.msk.f32.vlgmr.msra.gmra.mrb[0].mxu0 %vm431_vm1, %v591_v11  ;;  %vm1495_vm1 = vcmp.eq.s32.totalorder %v749_v36, 1 }
  0x90   : > { %v679_v12 = vpop.permute.xlu0 %678 }
 0x103   : > { %v668_v13 = vpop.f32.mrb[0].mxu0 }
 0x104   : > { %v681_v14 = vadd.f32 %v679_v12, %v668_v13  ;;  %v670_v15 = vpop.f32.mrb[1].mxu0 }
 0x105   : > { %v682_v16 = vadd.f32 %v679_v12, %v670_v15 }
 0x106   : > { %v1419_v17 = vmax.f32 %v681_v14, 0.0 }
 0x107   : > { %v1421_v18 = vmax.f32 %v682_v16, 0.0 }
 0x109   : > { %v1172_v19 = vpack.i.bf16 %v1421_v18, %v1419_v17 }
 0x10b   : > { %1173 = vrot.lane.b32.xlu1 %v1172_v19, %s1271_s15  ;;  %1168 = vrot.lane.b32.xlu0 %v1172_v19, %s1272_s16 }
 0x10f   : > { %1178 = vrot.lane.b32.xlu1 %v1172_v19, %s1273_s22  ;;  %1183 = vrot.lane.b32.xlu0 %v1172_v19, %s1274_s24 }
 0x113   : > { %1188 = vrot.lane.b32.xlu1 %v1172_v19, %s1275_s25  ;;  %1193 = vrot.lane.b32.xlu0 %v1172_v19, %s1276_s29  ;;  %s407_s25 = sand.u32 1, %s1259_s18  }
 0x114   : > { %s1046_s29 = sshll.u32 %s407_s25, 3  ;;  %s945_s15 = scalar_lea.sflag [#allocation3], %s407_s25 }
 0x117   : > { %1198 = vrot.lane.b32.xlu1 %v1172_v19, %s1277_s30  ;;  %836 = vrot.lane.b32.xlu0 %v1419_v17, %s1278_s12  ;;  %s1087_s30 = sshll.u32 %s1362_s21, 7  ;;  %s1280_s21 = smov [#allocation2]  }
 0x118   : > { %s1643_s14 = scalar_lea.hbm %s1696_s11, %s1087_s30  ;;  %s1209_s22 = sshll.u32 %s1280_s21, 4  ;;  %s1210_s22 = int_to_ptr.vmem [resolvable:$false] %s1209_s22 }
 0x119   : > { %s1211_s24 = scalar_lea.vmem %s1210_s22, 256 }
 0x11b   : > { %838 = vrot.lane.b32.xlu1 %v1421_v18, %s1278_s12  ;;  %861 = vperm.xlu0 %1166, %v858_v20   ;;  %s409_s12 = scalar_lea.vmem [#allocation2], %s1046_s29 }
 0x11c   : > { %s959_s19 = sshll.u32 %s409_s12, 4  ;;  %s1645_s19 = int_to_ptr.vmem [resolvable:$true] %s959_s19 }
 0x11d   : > { %s1205_s16 = scalar_lea.vmem %s1645_s19, 128  ;;  %p1212_p0 = scmp.lt.s32.totalorder %s1645_s19, %s1210_s22 }
 0x11e   : > { %p1206_p11 = scmp.ne.s32.totalorder %s1645_s19, %s1205_s16  ;;  %p1213_p1 = scmp.lt.s32.totalorder %s1211_s24, %s1205_s16 }
 0x120   : > { %p1207_p12 = pnand %p1206_p11, %p1379_p5  ;;  %p1214_p2 = por %p1213_p1, %p1212_p0 }
 0x122   : > { %p1208_p13 = pneg %p1207_p12 }
 0x124   : > { %p1215_p3 = pnand %p1214_p2, %p1208_p13 }
 0x17d   : > { %v1174_v44 = vpop.permute.xlu1 %1173  ;;  %v1169_v45 = vpop.permute.xlu0 %1168 }
 0x17e   : > { %v1176_v49 = vunpack.i.h.bf16 %v1174_v44  ;;  %v1175_v50 = vunpack.i.l.bf16 %v1174_v44  ;;  %v1171_v51 = vunpack.i.h.bf16 %v1169_v45  ;;  %v1170_v52 = vunpack.i.l.bf16 %v1169_v45 }
 0x180   : > { %v694_v57 = vsel %vm693_vm9, %v1170_v52, %v1171_v51  ;;  %v717_v58 = vsel %vm716_vm10, %v1175_v50, %v1176_v49  ;;  %v695_v59 = vsel %vm693_vm9, %v1171_v51, %v1170_v52  ;;  %v718_v60 = vsel %vm716_vm10, %v1176_v49, %v1175_v50  ;;  %vm1095_vm10 = vmpackc.low %vm1499_vm2, %vm1495_vm1 }
 0x181   : > { %v1179_v61 = vpop.permute.xlu1 %1178  ;;  %v1184_v62 = vpop.permute.xlu0 %1183  ;;  %v1088_v63 = vpack.c.bf16 %v717_v58, %v694_v57  ;;  %v1091_v0 = vpack.c.bf16 %v718_v60, %v695_v59  ;;  %vm778_vm9 = vcmp.lt.s32.totalorder %v1457_v31, 127  ;;  %vm1101_vm1 = vmpackc.low %vm1538_vm11, %vm1279_vm0 }
 0x182   : > { %v1181_v4 = vunpack.i.h.bf16 %v1179_v61  ;;  %v1180_v5 = vunpack.i.l.bf16 %v1179_v61  ;;  %v1186_v6 = vunpack.i.h.bf16 %v1184_v62  ;;  %v1185_v7 = vunpack.i.l.bf16 %v1184_v62  ;;  %vm1104_vm2 = vmpackc.low %vm1570_vm13, %vm1279_vm0 }
 0x183   : > { %1090 = vmatprep.subr.msk.bf16.mxu1 %vm1089_vm6, %v1088_v63  ;;  %vm1604_vm6 = vcmp.eq.s32.totalorder %v831_v21, 1 }
 0x184   : > { %v737_v10 = vsel %vm736_vm8, %v1180_v5, %v1181_v4  ;;  %v738_v11 = vsel %vm736_vm8, %v1181_v4, %v1180_v5  ;;  %v759_v12 = vsel %vm758_vm15, %v1185_v7, %v1186_v6  ;;  %v760_v13 = vsel %vm758_vm15, %v1186_v6, %v1185_v7  ;;  %1093 = vmatpush1.bf16.msk.msra.mxu1 %vm1092_vm14, %v1091_v0  ;;  %vm1098_vm8 = vmpackc.low %vm1507_vm5, %vm1503_vm3 }
 0x185   : > { %v1094_v15 = vpack.c.bf16 %v759_v12, %v737_v10  ;;  %v1097_v16 = vpack.c.bf16 %v760_v13, %v738_v11  ;;  %v1189_v19 = vpop.permute.xlu1 %1188  ;;  %v1194_v20 = vpop.permute.xlu0 %1193  ;;  %vm1582_vm15 = vcmp.eq.s32.totalorder %v811_v9, 1  ;;  %vm1608_vm14 = vcmp.eq.s32.totalorder %v807_v24, 1 }
 0x186   : > { %v1191_v23 = vunpack.i.h.bf16 %v1189_v19  ;;  %v1190_v27 = vunpack.i.l.bf16 %v1189_v19  ;;  %v1196_v34 = vunpack.i.h.bf16 %v1194_v20  ;;  %v1195_v35 = vunpack.i.l.bf16 %v1194_v20  ;;  %vm1107_vm5 = vmpackc.low %vm1604_vm6, %vm1582_vm15 }
 0x187   : > { %1096 = vmatprep.subr.msk.bf16.mxu1 %vm1095_vm10, %v1094_v15  ;;  %vm1612_vm3 = vcmp.eq.s32.totalorder %v827_v28, 1 }
 0x188   : > { %v779_v32 = vsel %vm778_vm9, %v1190_v27, %v1191_v23  ;;  %v780_v33 = vsel %vm778_vm9, %v1191_v23, %v1190_v27  ;;  %1099 = vmatpush1.bf16.msk.msra.mxu1 %vm1098_vm8, %v1097_v16  ;;  %v800_v43 = vsel %vm798_vm4, %v1196_v34, %v1195_v35  ;;  %vm840_vm9 = vcmp.lt.s32.totalorder %v1457_v31, 111  ;;  %vm1110_vm10 = vmpackc.low %vm1612_vm3, %vm1608_vm14  ;;  %v857_v31 = vld [vmem:[%s1692_s7] sm:$0xf] }
 0x189   : > { %v1100_v2 = vpack.c.bf16 %v780_v33, %v1421_v18  ;;  %v1103_v36 = vpack.c.bf16 %v779_v32, %v1419_v17  ;;  %v1199_v37 = vpop.permute.xlu1 %1198  ;;  %v852_v17 = vrot.slane %v844_v30, %v1447_v25  ;;  %v799_v18 = vsel %vm798_vm4, %v1195_v35, %v1196_v34  ;;  %v837_v49 = vpop.permute.xlu0 %836 }
 0x18a   : > { %v1201_v40 = vunpack.i.h.bf16 %v1199_v37  ;;  %v1200_v41 = vunpack.i.l.bf16 %v1199_v37  ;;  %vm864_vm8 = vcmask 588800  }
 0x18b   : > { %1102 = vmatprep.subr.msk.bf16.mxu1 %vm1101_vm1, %v1100_v2  ;;  %vm854_vm11 = vcmp.eq.s32.totalorder %v852_v17, 1 }
 0x18c   : > { %v821_v44 = vsel %vm820_vm7, %v1200_v41, %v1201_v40  ;;  %v822_v45 = vsel %vm820_vm7, %v1201_v40, %v1200_v41  ;;  %1105 = vmatpush1.bf16.msk.msra.mxu1 %vm1104_vm2, %v1103_v36 }
 0x18d   : > { %v1106_v25 = vpack.c.bf16 %v822_v45, %v800_v43  ;;  %v1109_v46 = vpack.c.bf16 %v821_v44, %v799_v18  ;;  %v839_v47 = vpop.permute.xlu1 %838 }
 0x18e   : > { %v842_v50 = vsel %vm840_vm9, %v839_v47, %v837_v49  ;;  %v841_v51 = vsel %vm840_vm9, %v837_v49, %v839_v47 }
 0x18f   : > { %1108 = vmatprep.subr.msk.bf16.mxu1 %vm1107_vm5, %v1106_v25 }
 0x190   : > { %1111 = vmatpush1.bf16.msk.msra.mxu1 %vm1110_vm10, %v1109_v46 }
 0x191   : > { %1076 = vmatprep.subr.msk.mxu1 %vm854_vm11, %v842_v50 }
 0x194   : > { %1077 = vmatpush1.msk.msra.mxu1 %vm853_vm12, %v841_v51 }
 0x195   : > { %1078 = vmatmul.mubr.msk.f32.vlgmr.msra.gmra.mrb[0].mxu1 %vm864_vm8, %v857_v31 }
 0x19a   : > { %v862_v26 = vpop.permute.xlu0 %861 }
 0x268   : > { %v934_v52 = vpop.f32.mrb[0].mxu1 }
 0x269   : > { %v935_v53 = vadd.f32 %v934_v52, %v862_v26  ;;  %v936_v54 = vpop.f32.mrb[1].mxu1 }
 0x26a   : > { %v937_v55 = vadd.f32 %v936_v54, %v862_v26 }
 0x26c   : > { %v941_v56 = vcombine.low %v935_v53, %v937_v55 }
 0x26e   : > { %943 = vst [vmem:[%s409_s12] sm:$0xff] %v941_v56 }
 0x26f   : > { %1218 = shalt.err (!%p1215_p3)
}
 0x270   : > { %s1219_s25 = scalar_lea.hbm %s1643_s14, 128  ;;  %s1223_s12 = scalar_lea.hbm %s1696_s11, 256 }
 0x271   : > { %p1220_p4 = scmp.ne.s32.totalorder %s1643_s14, %s1219_s25  ;;  %p1224_p9 = scmp.lt.u32.totalorder %s1643_s14, %s1696_s11 }
 0x272   : > { %p1225_p10 = scmp.lt.u32.totalorder %s1223_s12, %s1219_s25  ;;  %p1227_p12 = scmp.lt.u32.totalorder %s1219_s25, %s1643_s14 }
 0x273   : > { %p1221_p7 = pnand %p1220_p4, %p1379_p5 }
 0x274   : > { %p1226_p11 = por %p1225_p10, %p1224_p9 }
 0x275   : > { %p1222_p8 = pneg %p1221_p7 }
 0x276   : > { %p1228_p13 = por %p1227_p12, %p1226_p11 }
 0x278   : > { %p1229_p0 = pnand %p1228_p13, %p1222_p8 }
 0x27a   : > { %1232 = shalt.err (!%p1229_p0)
}
 0x27b   : > { %1116 = dma.vmem_to_hbm [thread:$0]  (%p1379_p5), %s1645_s19, 128, %s1643_s14, %s945_s15  }
 0x27c PF: > { %p1122_p1 = scmp.ge.s32.totalorder %s1267_s20, 2  ;;  %s971_s16 = sand.u32 1, %s1255_s17  }
 0x27d   : > { %s972_s21 = scalar_lea.sflag [#allocation3], %s971_s16 }
 0x27e   : > { %p1119_p2 = pnand %p1122_p1, %p1383_p6 }
 0x280   : > { %1250 = dma.done.wait (!%p1119_p2), %s972_s21, 128  }
 0x281   : > { %1252 = vsyncadd (!%p1119_p2), %s972_s21, 4294967168  ;;  %s1732_s22 = sld [smem:[#allocation5_spill]]  ;;  %s1733_s19 = sld [smem:[#allocation6_spill]] }
 0x282   : > { %p21_p3 = scmp.ge.s32.totalorder %s1366_s23, 4   ;;  %s1734_s17 = smov %s1259_s18 }
 0x283   : > { %s1736_s20 = smov %s1366_s23 }
 0x284   :  { %23 = sbr.rel (!%p21_p3) target bundleno = 3 (0x3), region = 105 }
 0x287   : > { %s1735_s18 = smov %s1732_s22 }
 0x28b   :  { %977 = vsyncpa [#allocation3], 1 }
 0x28c   :  { %979 = vsyncpa [#allocation3 + $0x1], 1 }

</bundles_post_ra>
